<compile_context>
chip_gen: v7x
topology: tpu7x:2x2x1
jax: 0.10.0
libtpu: 0.0.40
codegen_flags: <defaults>
</compile_context>

<pallas_src>
import numpy as np
import jax
import jax.numpy as jnp
from jax.experimental import pallas as pl
from jax.experimental.pallas import tpu as pltpu


# ---------------------------------------------------------------------------
# Kernel: one (tile_e, G) output tile.
#   d_ref   : (tile_e, 1)  distances column for this row tile
#   off_ref : (1, G)       Gaussian centers
#   w_ref   : (1, G)       Gaussian widths
#   out_ref : (tile_e, G)  smeared output tile (lane-dense: G on lanes)
# ---------------------------------------------------------------------------
def gaussian_smearing_kernel(d_ref, off_ref, w_ref, out_ref):
    d = d_ref[...]                       # (TE, 1)
    off = off_ref[...]                   # (1, G)
    w = w_ref[...]                       # (1, G)
    coeff = -0.5 / (w * w)               # (1, G) — tiny, recomputed per tile (matches forward)
    diff = d - off                       # (TE, G) lane-dense broadcast
    out_ref[...] = jnp.exp(coeff * (diff * diff))


# ---------------------------------------------------------------------------
# Wrapper: accepts distances of any shape, returns shape + (n_gaussians,).
# ---------------------------------------------------------------------------
def gaussian_smearing(distances, offsets, widths, *, tile_e=128):
    orig_shape = distances.shape
    d_flat = distances.reshape(-1)                     # (E,)
    E = d_flat.shape[0]
    G = offsets.shape[0]

    # Pad the edge axis so the grid tiles evenly (padded rows are dropped afterwards).
    E_pad = int(pl.cdiv(E, tile_e)) * tile_e
    if E_pad != E:
        d_flat = jnp.pad(d_flat, (0, E_pad - E))

    d2 = d_flat.reshape(E_pad, 1)                      # column layout: broadcast against (1, G)
    off2 = offsets.reshape(1, G)
    w2 = widths.reshape(1, G)

    out = pl.pallas_call(
        gaussian_smearing_kernel,
        out_shape=jax.ShapeDtypeStruct((E_pad, G), distances.dtype),
        grid_spec=pltpu.PrefetchScalarGridSpec(
            num_scalar_prefetch=0,
            grid=(E_pad // tile_e,),
            in_specs=[
                pl.BlockSpec((tile_e, 1), lambda i: (i, 0)),   # row tile of distances
                pl.BlockSpec((1, G), lambda i: (0, 0)),        # offsets (resident)
                pl.BlockSpec((1, G), lambda i: (0, 0)),        # widths  (resident)
            ],
            out_specs=pl.BlockSpec((tile_e, G), lambda i: (i, 0)),
        ),
        compiler_params=pltpu.CompilerParams(
            dimension_semantics=("parallel",)),
    )(d2, off2, w2)

    return out[:E].reshape(*orig_shape, G)


# ---------------------------------------------------------------------------
# Pure numpy reference (mirrors the torch forward exactly).
# ---------------------------------------------------------------------------
def reference(distances, offsets, widths):
    coeff = -0.5 / widths ** 2
    diff = distances[..., None] - offsets
    return np.exp(coeff * diff ** 2).astype(np.float32)


if __name__ == "__main__":
    # Module config (width=None, centered=False branch of __init__):
    start, stop, n_gaussians = 0.0, 5.0, 128          # G=128 -> fully lane-dense output
    offsets_np = np.linspace(start, stop, n_gaussians, dtype=np.float32)
    widths_np = np.full(n_gaussians, offsets_np[1] - offsets_np[0], dtype=np.float32)

    offsets = jnp.asarray(offsets_np)
    widths = jnp.asarray(widths_np)

    # Small deterministic input: distances for (batch=2, atoms=8, neighbors=16).
    key = jax.random.PRNGKey(0)
    distances = jax.random.uniform(key, (2, 8, 16), dtype=jnp.float32) * stop

    out = gaussian_smearing(distances, offsets, widths, tile_e=128)
    out = jax.block_until_ready(out)

    ref = reference(np.asarray(distances), offsets_np, widths_np)
    assert out.shape == distances.shape + (n_gaussians,)
    assert out.dtype == distances.dtype
    err = np.max(np.abs(np.asarray(out) - ref))
    assert np.allclose(np.asarray(out), ref, atol=1e-5, rtol=1e-5), err

    # TODO(synk): trainable=True only changes parameter registration (autograd), not the
    # forward math; the `centered` flag is unused by the provided forward.
    print("KERNEL_OK")
</pallas_src>

<mosaic_0001>
module attributes {stable_mosaic.version = 11 : i64} {
  func.func @gaussian_smearing_kernel(%arg0: i32, %arg1: memref<128x1xf32, #tpu.memory_space<vmem>>, %arg2: memref<1x128xf32, #tpu.memory_space<vmem>>, %arg3: memref<1x128xf32, #tpu.memory_space<vmem>>, %arg4: memref<128x128xf32, #tpu.memory_space<vmem>>) attributes {dimension_semantics = [#tpu.dimension_semantics<parallel>], iteration_bounds = array<i64: 2>, scalar_prefetch = 0 : i64, scratch_operands = 0 : i64, tpu.core_type = #tpu.core_type<tc>, window_params = [{transform_indices = @transform_0, window_bounds = array<i64: 128, 1>}, {pipeline_mode = #tpu.pipeline_mode<synchronous>, transform_indices = @transform_1, window_bounds = array<i64: 1, 128>}, {pipeline_mode = #tpu.pipeline_mode<synchronous>, transform_indices = @transform_2, window_bounds = array<i64: 1, 128>}, {transform_indices = @transform_3, window_bounds = array<i64: 128, 128>}]} {
    %c0 = arith.constant 0 : index
    %c0_0 = arith.constant 0 : index
    %0 = vector.load %arg1[%c0, %c0_0] : memref<128x1xf32, #tpu.memory_space<vmem>>, vector<128x1xf32>
    %c0_1 = arith.constant 0 : index
    %c0_2 = arith.constant 0 : index
    %1 = vector.load %arg2[%c0_1, %c0_2] : memref<1x128xf32, #tpu.memory_space<vmem>>, vector<1x128xf32>
    %c0_3 = arith.constant 0 : index
    %c0_4 = arith.constant 0 : index
    %2 = vector.load %arg3[%c0_3, %c0_4] : memref<1x128xf32, #tpu.memory_space<vmem>>, vector<1x128xf32>
    %3 = arith.mulf %2, %2 : vector<1x128xf32>
    %cst = arith.constant -5.000000e-01 : f32
    %4 = vector.broadcast %cst : f32 to vector<1x128xf32>
    %5 = arith.divf %4, %3 : vector<1x128xf32>
    %6 = vector.broadcast %0 : vector<128x1xf32> to vector<128x128xf32>
    %7 = vector.broadcast %1 : vector<1x128xf32> to vector<128x128xf32>
    %8 = arith.subf %6, %7 : vector<128x128xf32>
    %9 = arith.mulf %8, %8 : vector<128x128xf32>
    %10 = vector.broadcast %5 : vector<1x128xf32> to vector<128x128xf32>
    %11 = arith.mulf %10, %9 : vector<128x128xf32>
    %12 = math.exp %11 : vector<128x128xf32>
    %c0_5 = arith.constant 0 : index
    %c0_6 = arith.constant 0 : index
    %13 = vector.load %arg4[%c0_5, %c0_6] : memref<128x128xf32, #tpu.memory_space<vmem>>, vector<128x128xf32>
    tpu.vector_store %arg4[%c0_5, %c0_6], %12 {strides = array<i32>} : memref<128x128xf32, #tpu.memory_space<vmem>>, vector<128x128xf32>,
    return
  }
  func.func @transform_0(%arg0: i32) -> (i32, i32) {
    %c0_i32 = arith.constant 0 : i32
    %c0_i32_0 = arith.constant 0 : i32
    return %arg0, %c0_i32 : i32, i32
  }
  func.func @transform_1(%arg0: i32) -> (i32, i32) {
    %c0_i32 = arith.constant 0 : i32
    %c0_i32_0 = arith.constant 0 : i32
    %c0_i32_1 = arith.constant 0 : i32
    return %c0_i32, %c0_i32_0 : i32, i32
  }
  func.func @transform_2(%arg0: i32) -> (i32, i32) {
    %c0_i32 = arith.constant 0 : i32
    %c0_i32_0 = arith.constant 0 : i32
    %c0_i32_1 = arith.constant 0 : i32
    return %c0_i32, %c0_i32_0 : i32, i32
  }
  func.func @transform_3(%arg0: i32) -> (i32, i32) {
    %c0_i32 = arith.constant 0 : i32
    %c0_i32_0 = arith.constant 0 : i32
    return %arg0, %c0_i32 : i32, i32
  }
}

</mosaic_0001>

<bundles_post_ra>
// kernel: tpu_custom_call.1
= control target key start
LH: loop header
LB: loop body
LE: loop exit
PB: predicated region body
PF: predicated region fallthrough
CT: control target
= control target key end

     0   :  { %8 = vsyncpa [#allocation3], 0  ;;  %s804_s0 = inlined_call_operand.vmem [shape: f32[256,1], index: 0, kind: input, shape index: {}]   ;;  %s805_s1 = inlined_call_operand.vmem [shape: f32[1,128], index: 1, kind: input, shape index: {}]   ;;  %s806_s2 = inlined_call_operand.vmem [shape: f32[1,128], index: 2, kind: input, shape index: {}]   ;;  %s807_s3 = inlined_call_operand.hbm [shape: f32[256,128], index: 3, kind: output, shape index: {}]  }
   0x1   :  { %10 = vsyncpa [#allocation3 + $0x1], 0  ;;  %s637_s12 = smov 0   ;;  %s639_s13 = smov 0  }
   0x2   :  { %s641_s14 = smov 0   ;;  %s643_s15 = smov 0  }
   0x3 LB: > { %s658_s16 = sadd.s32 4294967295, %s611_s15   ;;  %s457_s17 = sadd.s32 4294967294, %s611_s15   ;;  %s611_s15 = sphi %s643_s15, %s813_s15   ;;  %s607_s14 = sphi %s641_s14, %s812_s14   ;;  %s603_s13 = sphi %s639_s13, %s811_s13   ;;  %s599_s12 = sphi %s637_s12, %s810_s12  }
   0x4   : > { %s662_s18 = sadd.s32 1, %s611_s15   ;;  %s91_s19 = sadd.s32 1, %s607_s14 }
   0x5   : > { %s88_s20 = ssub.s32 %s611_s15, %s662_s18  ;;  %p101_p0 = scmp.ne.s32.totalorder %s607_s14, %s603_s13 }
   0x6   : > { %p89_p1 = scmp.eq.s32.totalorder %s88_s20, 0  ;;  %p102_p2 = scmp.eq.s32.totalorder %s658_s16, 1 }
   0x7   : > { %p107_p3 = scmp.ne.s32.totalorder %s603_s13, %s599_s12  ;;  %p108_p4 = scmp.eq.s32.totalorder %s457_s17, 1 }
   0x8   : > { %s673_s21 = scalar_select %p89_p1, %s607_s14, %s91_s19  }
   0x9   : > { %p675_p5 = por %p102_p2, %p101_p0  ;;  %p679_p6 = por %p108_p4, %p107_p3 }
   0xa   : > { %p460_p7 = scmp.ge.s32.totalorder %s611_s15, 1  ;;  %p141_p8 = scmp.lt.s32.totalorder %s611_s15, 3 }
   0xc   : > { %p142_p9 = pnand %p460_p7, %p141_p8 }
   0xd   : > { %s462_s24 = sshll.u32 (!%p142_p9), %s658_s16, 4  ;;  %v613_v0 = vmov (!%p142_p9), 0   ;;  %v189_v17 = vld [vmem:[%s806_s2] sm:$0x1] (!%p142_p9)  ;;  %v312_v19 = vlaneseq (!%p142_p9)  ;;  %s162_s6 = sand.u32 (!%p142_p9), 1, %s603_s13  }
   0xe   : > { %145 = sbr.rel (%p142_p9) target bundleno = 216 (0xd8), region = 32  ;;  %514 = vset.pattern.permute.xlu1 (!%p142_p9), %v613_v0  ;;  %513 = vset.pattern.permute.xlu0 (!%p142_p9), %v613_v0  ;;  %p166_p10 = scmp.lt.s32.totalorder (!%p142_p9), %s462_s24, 31  ;;  %v190_v18 = vmul.f32 (!%p142_p9), %v189_v17, %v189_v17  ;;  %v695_v24 = vld [vmem:[%s805_s1] ss:$0 sm:$0xff] (!%p142_p9) }
   0xf   : > { %v313_v20 = vshrl.u32 (!%p142_p9), %v312_v19, 7  ;;  %s461_s7 = sshll.u32 (!%p142_p9), %s162_s6, 7  ;;  %s470_s9 = sshll.u32 (!%p142_p9), %s658_s16, 11 }
  0x10   : > { %515 = vrcp.f32 (!%p142_p9), %v190_v18  ;;  %s720_s8 = scalar_lea.vmem (!%p142_p9), [#allocation2], %s461_s7  ;;  %s755_s19 = scalar_lea.hbm (!%p142_p9), %s807_s3, %s470_s9 }
  0x11   : > { %v314_v23 = vsub.s32 (!%p142_p9), 0, %v313_v20  ;;  %s395_s10 = sshll.u32 (!%p142_p9), %s720_s8, 4  ;;  %s763_s16 = scalar_lea.sflag (!%p142_p9), [#allocation3], %s162_s6  ;;  %s757_s10 = int_to_ptr.vmem [resolvable:$true] %s395_s10 }
  0x12   : > { %s549_s20 = scalar_lea.vmem (!%p142_p9), %s757_s10, 2048 }
  0x13   : > { %p550_p11 = scmp.ne.s32.totalorder (!%p142_p9), %s757_s10, %s549_s20 }
  0x15   : > { %s815_s24 = smov (!%p166_p10, %s462_s24), 31  ;;  %p551_p12 = pnand %p550_p11, %p675_p5 }
  0x16   : > { %s463_s25 = sshll.u32 %s815_s24, 3  ;;  %s614_s24 = smov [#allocation2]  }
  0x17   : > { %s169_s28 = scalar_lea.vmem %s804_s0, %s463_s25  ;;  %p552_p13 = pneg %p551_p12 }
  0x18   : > { %v174_v1 = vld [vmem:[%s169_s28 + $0x10] sm:$0xff]  ;;  %v172_v2 = vld [vmem:[%s169_s28] sm:$0xff]  ;;  %v175_v3 = vld [vmem:[%s169_s28 + $0x18] sm:$0xff]  ;;  %s553_s25 = sshll.u32 %s614_s24, 4  ;;  %s554_s25 = int_to_ptr.vmem [resolvable:$false] %s553_s25 }
  0x19   : > { %205 = vperm.xlu1 %514, %v174_v1   ;;  %195 = vperm.xlu0 %513, %v172_v2   ;;  %v173_v4 = vld [vmem:[%s169_s28 + $0x8] sm:$0xff]  ;;  %v176_v6 = vld [vmem:[%s169_s28 + $0x20] sm:$0xff]  ;;  %v179_v7 = vld [vmem:[%s169_s28 + $0x38] sm:$0xff]  ;;  %s555_s26 = scalar_lea.vmem %s554_s25, 4096  ;;  %p556_p0 = scmp.lt.s32.totalorder %s757_s10, %s554_s25 }
  0x1a   : > { %v177_v5 = vld [vmem:[%s169_s28 + $0x28] sm:$0xff]  ;;  %v178_v8 = vld [vmem:[%s169_s28 + $0x30] sm:$0xff]  ;;  %v180_v10 = vld [vmem:[%s169_s28 + $0x40] sm:$0xff]  ;;  %v516_v21 = vpop.eup %515  ;;  %p557_p1 = scmp.lt.s32.totalorder %s555_s26, %s549_s20 }
  0x1b   : > { %v181_v9 = vld [vmem:[%s169_s28 + $0x48] sm:$0xff]  ;;  %v183_v11 = vld [vmem:[%s169_s28 + $0x58] sm:$0xff]  ;;  %v182_v12 = vld [vmem:[%s169_s28 + $0x50] sm:$0xff]  ;;  %v192_v22 = vmul.f32 -0.5, %v516_v21 }
  0x1c   : > { %v185_v13 = vld [vmem:[%s169_s28 + $0x68] sm:$0xff]  ;;  %v184_v14 = vld [vmem:[%s169_s28 + $0x60] sm:$0xff]  ;;  %v187_v15 = vld [vmem:[%s169_s28 + $0x78] sm:$0xff]  ;;  %p558_p2 = por %p557_p1, %p556_p0 }
  0x1d   : > { %210 = vperm.xlu1 %514, %v175_v3   ;;  %200 = vperm.xlu0 %513, %v173_v4   ;;  %v186_v16 = vld [vmem:[%s169_s28 + $0x70] sm:$0xff]  ;;  %v697_v27 = vrot.slane %v192_v22, %v314_v23 }
  0x1e   : > { %p559_p3 = pnand %p558_p2, %p552_p13 }
  0x21   : > { %220 = vperm.xlu1 %514, %v177_v5   ;;  %215 = vperm.xlu0 %513, %v176_v6  }
  0x25   : > { %230 = vperm.xlu1 %514, %v179_v7   ;;  %225 = vperm.xlu0 %513, %v178_v8  }
  0x29   : > { %240 = vperm.xlu1 %514, %v181_v9   ;;  %235 = vperm.xlu0 %513, %v180_v10  }
  0x2d   : > { %250 = vperm.xlu1 %514, %v183_v11   ;;  %245 = vperm.xlu0 %513, %v182_v12  }
  0x31   : > { %260 = vperm.xlu1 %514, %v185_v13   ;;  %255 = vperm.xlu0 %513, %v184_v14  }
  0x35   : > { %270 = vperm.xlu1 %514, %v187_v15   ;;  %265 = vperm.xlu0 %513, %v186_v16  }
  0x98   : > { %v206_v25 = vpop.permute.xlu1 %205  ;;  %v196_v26 = vpop.permute.xlu0 %195 }
  0x99   : > { %v281_v28 = vsub.f32 %v206_v25, %v695_v24  ;;  %v279_v29 = vsub.f32 %v196_v26, %v695_v24 }
  0x9b   : > { %v297_v30 = vmul.f32 %v281_v28, %v281_v28  ;;  %v295_v31 = vmul.f32 %v279_v29, %v279_v29 }
  0x9c   : > { %v211_v32 = vpop.permute.xlu1 %210  ;;  %v201_v33 = vpop.permute.xlu0 %200 }
  0x9d   : > { %v319_v34 = vmul.f32 %v697_v27, %v297_v30  ;;  %v317_v35 = vmul.f32 %v697_v27, %v295_v31  ;;  %v282_v36 = vsub.f32 %v211_v32, %v695_v24  ;;  %v280_v37 = vsub.f32 %v201_v33, %v695_v24 }
  0x9f   : > { %v337_v38 = vmul.f32 1.442695, %v319_v34  ;;  %v333_v39 = vmul.f32 1.442695, %v317_v35  ;;  %v298_v40 = vmul.f32 %v282_v36, %v282_v36  ;;  %v296_v41 = vmul.f32 %v280_v37, %v280_v37 }
  0xa0   : > { %v221_v42 = vpop.permute.xlu1 %220  ;;  %v216_v43 = vpop.permute.xlu0 %215 }
  0xa1   : > { %517 = vpow2.f32 %v337_v38  ;;  %v320_v44 = vmul.f32 %v697_v27, %v298_v40  ;;  %v318_v45 = vmul.f32 %v697_v27, %v296_v41  ;;  %v284_v46 = vsub.f32 %v221_v42, %v695_v24 }
  0xa2   : > { %519 = vpow2.f32 %v333_v39  ;;  %v283_v47 = vsub.f32 %v216_v43, %v695_v24 }
  0xa3   : > { %v339_v48 = vmul.f32 1.442695, %v320_v44  ;;  %v335_v49 = vmul.f32 1.442695, %v318_v45  ;;  %v300_v50 = vmul.f32 %v284_v46, %v284_v46 }
  0xa4   : > { %v299_v51 = vmul.f32 %v283_v47, %v283_v47  ;;  %v231_v52 = vpop.permute.xlu1 %230  ;;  %v226_v53 = vpop.permute.xlu0 %225 }
  0xa5   : > { %521 = vpow2.f32 %v339_v48  ;;  %v322_v54 = vmul.f32 %v697_v27, %v300_v50  ;;  %v286_v55 = vsub.f32 %v231_v52, %v695_v24  ;;  %v285_v56 = vsub.f32 %v226_v53, %v695_v24 }
  0xa6   : > { %523 = vpow2.f32 %v335_v49  ;;  %v321_v57 = vmul.f32 %v697_v27, %v299_v51 }
  0xa7   : > { %v343_v58 = vmul.f32 1.442695, %v322_v54  ;;  %v302_v59 = vmul.f32 %v286_v55, %v286_v55  ;;  %v301_v60 = vmul.f32 %v285_v56, %v285_v56 }
  0xa8   : > { %v341_v61 = vmul.f32 1.442695, %v321_v57  ;;  %v241_v62 = vpop.permute.xlu1 %240  ;;  %v236_v63 = vpop.permute.xlu0 %235 }
  0xa9   : > { %525 = vpow2.f32 %v343_v58  ;;  %v324_v0 = vmul.f32 %v697_v27, %v302_v59  ;;  %v323_v1 = vmul.f32 %v697_v27, %v301_v60  ;;  %v288_v2 = vsub.f32 %v241_v62, %v695_v24 }
  0xaa   : > { %527 = vpow2.f32 %v341_v61  ;;  %v287_v3 = vsub.f32 %v236_v63, %v695_v24 }
  0xab   : > { %v518_v4 = vpop.eup %517  ;;  %v347_v5 = vmul.f32 1.442695, %v324_v0  ;;  %v345_v6 = vmul.f32 1.442695, %v323_v1  ;;  %v304_v7 = vmul.f32 %v288_v2, %v288_v2 }
  0xac   : > { %v520_v8 = vpop.eup %519  ;;  %367 = vst [vmem:[%s720_s8 + $0x10] sm:$0xff] %v518_v4  ;;  %v303_v9 = vmul.f32 %v287_v3, %v287_v3  ;;  %v251_v10 = vpop.permute.xlu1 %250 }
  0xad   : > { %v246_v11 = vpop.permute.xlu0 %245  ;;  %365 = vst [vmem:[%s720_s8] sm:$0xff] %v520_v8  ;;  %529 = vpow2.f32 %v347_v5  ;;  %v326_v12 = vmul.f32 %v697_v27, %v304_v7  ;;  %v290_v13 = vsub.f32 %v251_v10, %v695_v24 }
  0xae   : > { %v289_v14 = vsub.f32 %v246_v11, %v695_v24  ;;  %531 = vpow2.f32 %v345_v6  ;;  %v325_v15 = vmul.f32 %v697_v27, %v303_v9 }
  0xaf   : > { %v522_v16 = vpop.eup %521  ;;  %v351_v17 = vmul.f32 1.442695, %v326_v12  ;;  %v306_v18 = vmul.f32 %v290_v13, %v290_v13 }
  0xb0   : > { %v305_v19 = vmul.f32 %v289_v14, %v289_v14  ;;  %v524_v20 = vpop.eup %523  ;;  %368 = vst [vmem:[%s720_s8 + $0x18] sm:$0xff] %v522_v16  ;;  %v349_v21 = vmul.f32 1.442695, %v325_v15  ;;  %v261_v22 = vpop.permute.xlu1 %260 }
  0xb1   : > { %v256_v23 = vpop.permute.xlu0 %255  ;;  %366 = vst [vmem:[%s720_s8 + $0x8] sm:$0xff] %v524_v20  ;;  %533 = vpow2.f32 %v351_v17  ;;  %v328_v25 = vmul.f32 %v697_v27, %v306_v18  ;;  %v292_v28 = vsub.f32 %v261_v22, %v695_v24 }
  0xb2   : > { %v327_v26 = vmul.f32 %v697_v27, %v305_v19  ;;  %535 = vpow2.f32 %v349_v21  ;;  %v291_v29 = vsub.f32 %v256_v23, %v695_v24 }
  0xb3   : > { %v526_v30 = vpop.eup %525  ;;  %v355_v31 = vmul.f32 1.442695, %v328_v25  ;;  %v308_v33 = vmul.f32 %v292_v28, %v292_v28 }
  0xb4   : > { %v353_v32 = vmul.f32 1.442695, %v327_v26  ;;  %v528_v34 = vpop.eup %527  ;;  %370 = vst [vmem:[%s720_s8 + $0x28] sm:$0xff] %v526_v30  ;;  %v307_v35 = vmul.f32 %v291_v29, %v291_v29  ;;  %v271_v36 = vpop.permute.xlu1 %270 }
  0xb5   : > { %v266_v37 = vpop.permute.xlu0 %265  ;;  %369 = vst [vmem:[%s720_s8 + $0x20] sm:$0xff] %v528_v34  ;;  %537 = vpow2.f32 %v355_v31  ;;  %v330_v38 = vmul.f32 %v697_v27, %v308_v33  ;;  %v294_v39 = vsub.f32 %v271_v36, %v695_v24 }
  0xb6   : > { %v293_v40 = vsub.f32 %v266_v37, %v695_v24  ;;  %539 = vpow2.f32 %v353_v32  ;;  %v329_v41 = vmul.f32 %v697_v27, %v307_v35 }
  0xb7   : > { %v530_v42 = vpop.eup %529  ;;  %v359_v43 = vmul.f32 1.442695, %v330_v38  ;;  %v310_v44 = vmul.f32 %v294_v39, %v294_v39 }
  0xb8   : > { %v309_v45 = vmul.f32 %v293_v40, %v293_v40  ;;  %v532_v46 = vpop.eup %531  ;;  %372 = vst [vmem:[%s720_s8 + $0x38] sm:$0xff] %v530_v42  ;;  %v357_v47 = vmul.f32 1.442695, %v329_v41 }
  0xb9   : > { %371 = vst [vmem:[%s720_s8 + $0x30] sm:$0xff] %v532_v46  ;;  %541 = vpow2.f32 %v359_v43  ;;  %v332_v48 = vmul.f32 %v697_v27, %v310_v44 }
  0xba   : > { %v331_v24 = vmul.f32 %v697_v27, %v309_v45  ;;  %543 = vpow2.f32 %v357_v47 }
  0xbb   : > { %v534_v49 = vpop.eup %533  ;;  %v363_v50 = vmul.f32 1.442695, %v332_v48 }
  0xbc   : > { %v361_v51 = vmul.f32 1.442695, %v331_v24  ;;  %v536_v52 = vpop.eup %535  ;;  %374 = vst [vmem:[%s720_s8 + $0x48] sm:$0xff] %v534_v49 }
  0xbd   : > { %373 = vst [vmem:[%s720_s8 + $0x40] sm:$0xff] %v536_v52  ;;  %545 = vpow2.f32 %v363_v50 }
  0xbe   : > { %547 = vpow2.f32 %v361_v51 }
  0xbf   : > { %v538_v53 = vpop.eup %537 }
  0xc0   : > { %v540_v54 = vpop.eup %539  ;;  %376 = vst [vmem:[%s720_s8 + $0x58] sm:$0xff] %v538_v53 }
  0xc1   : > { %375 = vst [vmem:[%s720_s8 + $0x50] sm:$0xff] %v540_v54 }
  0xc3   : > { %v542_v27 = vpop.eup %541 }
  0xc4   : > { %v544_v55 = vpop.eup %543  ;;  %378 = vst [vmem:[%s720_s8 + $0x68] sm:$0xff] %v542_v27 }
  0xc5   : > { %377 = vst [vmem:[%s720_s8 + $0x60] sm:$0xff] %v544_v55 }
  0xc7   : > { %v546_v56 = vpop.eup %545 }
  0xc8   : > { %v548_v57 = vpop.eup %547  ;;  %380 = vst [vmem:[%s720_s8 + $0x78] sm:$0xff] %v546_v56 }
  0xc9   : > { %379 = vst [vmem:[%s720_s8 + $0x70] sm:$0xff] %v548_v57 }
  0xca   : > { %562 = shalt.err (!%p559_p3)
}
  0xcb   : > { %s563_s27 = scalar_lea.hbm %s755_s19, 2048  ;;  %s567_s30 = scalar_lea.hbm %s807_s3, 4096 }
  0xcc   : > { %p564_p4 = scmp.ne.s32.totalorder %s755_s19, %s563_s27  ;;  %p568_p9 = scmp.lt.u32.totalorder %s755_s19, %s807_s3 }
  0xcd   : > { %p569_p10 = scmp.lt.u32.totalorder %s567_s30, %s563_s27  ;;  %p571_p12 = scmp.lt.u32.totalorder %s563_s27, %s755_s19 }
  0xce   : > { %p565_p7 = pnand %p564_p4, %p675_p5 }
  0xcf   : > { %p570_p11 = por %p569_p10, %p568_p9 }
  0xd0   : > { %p566_p8 = pneg %p565_p7 }
  0xd1   : > { %p572_p13 = por %p571_p12, %p570_p11 }
  0xd3   : > { %p573_p0 = pnand %p572_p13, %p566_p8 }
  0xd5   : > { %576 = shalt.err (!%p573_p0)
}
  0xd6   : > { %s615_s6 = smov 128   ;;  %s616_s7 = smov 8  }
  0xd7   : > { %471 = dma.vmem_to_hbm [thread:$0]  (%p675_p5), %s757_s10, 2048, %s755_s19, %s763_s16, %s615_s6, %s615_s6, %s616_s7  }
  0xd8 PF: > { %p477_p1 = scmp.ge.s32.totalorder %s611_s15, 2  ;;  %s410_s8 = sand.u32 1, %s599_s12  }
  0xd9   : > { %s411_s9 = scalar_lea.sflag [#allocation3], %s410_s8 }
  0xda   : > { %p474_p2 = pnand %p477_p1, %p679_p6 }
  0xdc   : > { %594 = dma.done.wait (!%p474_p2), %s411_s9, 2048  }
  0xdd   : > { %596 = vsyncadd (!%p474_p2), %s411_s9, 4294965248  ;;  %p13_p3 = scmp.ge.s32.totalorder %s662_s18, 4   ;;  %s810_s12 = smov %s603_s13 }
  0xde   : > { %s811_s13 = smov %s607_s14  ;;  %s812_s14 = smov %s673_s21 }
  0xdf   : > { %s813_s15 = smov %s662_s18  ;;  %15 = sbr.rel (!%p13_p3) target bundleno = 3 (0x3), region = 67 }
  0xe6   :  { %416 = vsyncpa [#allocation3], 1 }
  0xe7   :  { %418 = vsyncpa [#allocation3 + $0x1], 1 }

</bundles_post_ra>
